<compile_context>
chip_gen: v7x
topology: tpu7x:2x2x1
jax: 0.10.0
libtpu: 0.0.40
codegen_flags: <defaults>
</compile_context>

<pallas_src>
import functools
import math

import jax
import jax.numpy as jnp
from jax.experimental import pallas as pl
from jax.experimental.pallas import tpu as pltpu

MIN_SIGMA = 0.01
_HALF_LOG_2PI = 0.5 * math.log(2.0 * math.pi)
_FLAT_MAX_TILE = 8192          # lanes per block in the D % 128 != 0 fallback


def _chip_budget():
    """(max_block_rows, vmem_limit_bytes) tuned per TPU generation."""
    max_rows, vmem_limit = 4096, 32 * 1024 * 1024          # safe default
    try:
        vmem_cap = getattr(pltpu.get_tpu_info(), "vmem_capacity_bytes", None)
        if vmem_cap is not None:
            if vmem_cap >= 96 * 1024 * 1024:               # v5e / v6e: 128 MiB
                max_rows, vmem_limit = 8192, 64 * 1024 * 1024
            else:                                          # v7x: 64 MiB per TC
                max_rows, vmem_limit = 4096, 40 * 1024 * 1024
    except Exception:
        pass
    return max_rows, vmem_limit


def _pick_block_rows(rows, max_rows):
    """Largest multiple-of-8 divisor of `rows` <= max_rows; else max_rows."""
    cap = max(8, (max_rows // 8) * 8)
    b = cap
    while b >= 256:
        if rows % b == 0:
            return b
        b -= 8
    return cap


def _log_prob(mu, sp, gt, min_sigma, approx_reciprocal):
    # Numerically-stable softplus without logaddexp's isnan/where plumbing.
    softplus = jnp.maximum(sp, 0.0) + jnp.log1p(jnp.exp(-jnp.abs(sp)))
    sigma = jnp.maximum(softplus, min_sigma)
    diff = gt - mu
    if approx_reciprocal:
        z = diff * pl.reciprocal(sigma, approx=True)   # EUP slot, ~12-bit
    else:
        z = diff / sigma
    return -0.5 * z * z - jnp.log(sigma) - _HALF_LOG_2PI


# ---------------------------------------------------------------------------
# Dense path, small/medium samples: whole-sample blocks, several samples/step.
# ---------------------------------------------------------------------------
def _batch_kernel(*refs, has_mask, min_sigma, approx_reciprocal):
    if has_mask:
        params_ref, gt_ref, mask_ref, out_ref = refs
    else:
        params_ref, gt_ref, out_ref = refs

    mu = params_ref[:, 0].astype(jnp.float32)        # (bb, rows, 128)
    sp = params_ref[:, 1].astype(jnp.float32)
    gt = gt_ref[...].astype(jnp.float32)
    lp = _log_prob(mu, sp, gt, min_sigma, approx_reciprocal)
    if has_mask:
        lp = lp * mask_ref[...].astype(jnp.float32)
    per_lane = jnp.sum(lp, axis=1, keepdims=True)          # (bb, 1, 128)
    out_ref[...] = jnp.sum(per_lane, axis=2, keepdims=True)  # (bb, 1, 1)


# ---------------------------------------------------------------------------
# Dense path, large samples: (batch, row-block) grid, resident accumulator.
# ---------------------------------------------------------------------------
def _rows_kernel(*refs, has_mask, min_sigma, tail_rows, approx_reciprocal):
    if has_mask:
        params_ref, gt_ref, mask_ref, out_ref, acc_ref = refs
    else:
        params_ref, gt_ref, out_ref, acc_ref = refs

    r = pl.program_id(1)
    nr = pl.num_programs(1)

    @pl.when(r == 0)
    def _():
        acc_ref[...] = jnp.zeros_like(acc_ref)

    def accumulate(mask_tail):
        mu = params_ref[0, 0].astype(jnp.float32)    # (block_rows, 128)
        sp = params_ref[0, 1].astype(jnp.float32)
        gt = gt_ref[0].astype(jnp.float32)
        lp = _log_prob(mu, sp, gt, min_sigma, approx_reciprocal)
        if has_mask:
            lp = lp * mask_ref[0].astype(jnp.float32)
        if mask_tail:
            # Ragged final block: out-of-range rows hold garbage from the
            # clipped DMA; `where` (not multiply) so NaN/Inf cannot leak.
            row_ids = jax.lax.broadcasted_iota(jnp.int32, lp.shape, 0)
            lp = jnp.where(row_ids < tail_rows, lp, 0.0)
        acc_ref[...] += lp                           # pure VALU adds

    if tail_rows is None:
        accumulate(False)
    else:
        @pl.when(r < nr - 1)
        def _():
            accumulate(False)

        @pl.when(r == nr - 1)
        def _():
            accumulate(True)

    @pl.when(r == nr - 1)
    def _():
        # Single deferred cross-lane/sublane reduce per sample.
        out_ref[...] = jnp.sum(acc_ref[...]).reshape(1, 1, 1)


# ---------------------------------------------------------------------------
# Fallback path (D % 128 != 0): (batch-block, lane-tile) grid.
# ---------------------------------------------------------------------------
def _flat_kernel(*refs, has_mask, min_sigma, tail_lanes, approx_reciprocal):
    if has_mask:
        params_ref, gt_ref, mask_ref, out_ref = refs
    else:
        params_ref, gt_ref, out_ref = refs

    k = pl.program_id(1)
    nk = pl.num_programs(1)

    @pl.when(k == 0)
    def _():
        out_ref[...] = jnp.zeros_like(out_ref)

    def accumulate(mask_tail):
        mu = params_ref[:, 0].astype(jnp.float32)    # (bb, tile)
        sp = params_ref[:, 1].astype(jnp.float32)
        gt = gt_ref[:, 0].astype(jnp.float32)
        lp = _log_prob(mu, sp, gt, min_sigma, approx_reciprocal)
        if has_mask:
            lp = lp * mask_ref[:, 0].astype(jnp.float32)
        if mask_tail:
            lane_ids = jax.lax.broadcasted_iota(jnp.int32, lp.shape, 1)
            lp = jnp.where(lane_ids < tail_lanes, lp, 0.0)
        out_ref[...] += jnp.sum(lp, axis=-1, keepdims=True).reshape(out_ref.shape)

    if tail_lanes is None:
        accumulate(False)
    else:
        @pl.when(k < nk - 1)
        def _():
            accumulate(False)

        @pl.when(k == nk - 1)
        def _():
            accumulate(True)


# ---------------------------------------------------------------------------
# Wrapper
# ---------------------------------------------------------------------------
def gaussian_loglike(distr_params, groundtruth, mask=None, min_sigma=MIN_SIGMA,
                     approx_reciprocal=False,
                     _force_max_rows=None, _force_flat_tile=None):
    """distr_params: (N, 2C, H, W); groundtruth/mask: (N, C, H, W) -> (N,)."""
    n, two_c, h, w = distr_params.shape
    c = two_c // 2
    assert two_c == 2 * c, "channel dim of distr_params must be even"
    assert groundtruth.shape == (n, c, h, w)
    d = c * h * w
    has_mask = mask is not None

    max_rows, vmem_limit = _chip_budget()
    if _force_max_rows is not None:          # test hook only
        max_rows = _force_max_rows
    step_budget = max(vmem_limit // 4, 2 * 1024 * 1024)

    p_es = jnp.dtype(distr_params.dtype).itemsize
    g_es = jnp.dtype(groundtruth.dtype).itemsize
    m_es = jnp.dtype(mask.dtype).itemsize if has_mask else 0

    if d % 128 == 0:
        rows = d // 128
        params = distr_params.reshape(n, 2, rows, 128)      # contiguous view
        gt = groundtruth.reshape(n, rows, 128)
        mk = mask.reshape(n, rows, 128) if has_mask else None

        if rows <= max_rows:
            # --- whole-sample blocks, several samples per grid step --------
            per_sample = rows * 128 * (2 * p_es + g_es + m_es)
            bb = int(max(1, min(n, step_budget // max(per_sample, 1))))
            inputs = [params, gt]
            in_specs = [
                pl.BlockSpec((bb, 2, rows, 128), lambda b: (b, 0, 0, 0)),
                pl.BlockSpec((bb, rows, 128), lambda b: (b, 0, 0)),
            ]
            if has_mask:
                inputs.append(mk)
                in_specs.append(pl.BlockSpec((bb, rows, 128), lambda b: (b, 0, 0)))
            kernel = functools.partial(
                _batch_kernel, has_mask=has_mask, min_sigma=min_sigma,
                approx_reciprocal=approx_reciprocal)
            out = pl.pallas_call(
                kernel,
                out_shape=jax.ShapeDtypeStruct((n, 1, 1), jnp.float32),
                grid_spec=pltpu.PrefetchScalarGridSpec(
                    num_scalar_prefetch=0,
                    grid=(pl.cdiv(n, bb),),
                    in_specs=in_specs,
                    out_specs=pl.BlockSpec((bb, 1, 1), lambda b: (b, 0, 0)),
                ),
                compiler_params=pltpu.CompilerParams(
                    dimension_semantics=("parallel",),
                    vmem_limit_bytes=vmem_limit),
            )(*inputs)
            return out.reshape(n)

        # --- big samples: (batch, row-block) grid, resident accumulator ----
        block_rows = _pick_block_rows(rows, max_rows)
        rem = rows % block_rows
        tail_rows = rem if rem else None
        feat_spec = pl.BlockSpec((1, block_rows, 128), lambda b, r: (b, r, 0))
        inputs = [params, gt]
        in_specs = [
            pl.BlockSpec((1, 2, block_rows, 128), lambda b, r: (b, 0, r, 0)),
            feat_spec,
        ]
        if has_mask:
            inputs.append(mk)
            in_specs.append(feat_spec)
        kernel = functools.partial(
            _rows_kernel, has_mask=has_mask, min_sigma=min_sigma,
            tail_rows=tail_rows, approx_reciprocal=approx_reciprocal)
        out = pl.pallas_call(
            kernel,
            out_shape=jax.ShapeDtypeStruct((n, 1, 1), jnp.float32),
            grid_spec=pltpu.PrefetchScalarGridSpec(
                num_scalar_prefetch=0,
                grid=(n, pl.cdiv(rows, block_rows)),
                in_specs=in_specs,
                out_specs=pl.BlockSpec((1, 1, 1), lambda b, r: (b, 0, 0)),
                scratch_shapes=[pltpu.VMEM((block_rows, 128), jnp.float32)],
            ),
            compiler_params=pltpu.CompilerParams(
                dimension_semantics=("parallel", "arbitrary"),
                vmem_limit_bytes=vmem_limit),
        )(*inputs)
        return out.reshape(n)

    # --- fallback: D not a multiple of 128 ---------------------------------
    max_tile = _force_flat_tile if _force_flat_tile is not None else _FLAT_MAX_TILE
    tile = d if d <= max_tile else (max_tile // 128) * 128
    rem = d % tile
    tail_lanes = rem if rem else None

    params = distr_params.reshape(n, 2, d)                   # contiguous view
    gt = groundtruth.reshape(n, 1, d)
    mk = mask.reshape(n, 1, d) if has_mask else None

    per_sample = tile * (2 * p_es + g_es + m_es)
    bb = int(max(1, min(n, step_budget // max(per_sample, 1))))

    inputs = [params, gt]
    in_specs = [
        pl.BlockSpec((bb, 2, tile), lambda b, k: (b, 0, k)),
        pl.BlockSpec((bb, 1, tile), lambda b, k: (b, 0, k)),
    ]
    if has_mask:
        inputs.append(mk)
        in_specs.append(pl.BlockSpec((bb, 1, tile), lambda b, k: (b, 0, k)))
    kernel = functools.partial(
        _flat_kernel, has_mask=has_mask, min_sigma=min_sigma,
        tail_lanes=tail_lanes, approx_reciprocal=approx_reciprocal)
    out = pl.pallas_call(
        kernel,
        out_shape=jax.ShapeDtypeStruct((n, 1, 1), jnp.float32),
        grid_spec=pltpu.PrefetchScalarGridSpec(
            num_scalar_prefetch=0,
            grid=(pl.cdiv(n, bb), pl.cdiv(d, tile)),
            in_specs=in_specs,
            out_specs=pl.BlockSpec((bb, 1, 1), lambda b, k: (b, 0, 0)),
        ),
        compiler_params=pltpu.CompilerParams(
            dimension_semantics=("parallel", "arbitrary"),
            vmem_limit_bytes=vmem_limit),
    )(*inputs)
    return out.reshape(n)


def _reference(distr_params, groundtruth, mask=None, min_sigma=MIN_SIGMA):
    n, two_c = distr_params.shape[0], distr_params.shape[1]
    c = two_c // 2
    mu = distr_params[:, :c]
    sigma = jnp.maximum(jax.nn.softplus(distr_params[:, c:]), min_sigma)
    lp = (-0.5 * ((groundtruth - mu) / sigma) ** 2
          - jnp.log(sigma) - _HALF_LOG_2PI)
    if mask is not None:
        lp = lp * mask
    return lp.reshape(n, -1).sum(-1)


if __name__ == "__main__":
    key = jax.random.PRNGKey(0)
    k1, k2, k3 = jax.random.split(key, 3)

    N, C, H, W = 2, 4, 16, 16                   # D = 1024 -> rows = 8
    distr_params = jax.random.normal(k1, (N, 2 * C, H, W), dtype=jnp.float32)
    groundtruth = jax.random.normal(k2, (N, C, H, W), dtype=jnp.float32)
    mask = (jax.random.uniform(k3, (N, C, H, W)) > 0.3).astype(jnp.float32)

    # 1) dense whole-sample path (batch-blocked), with mask
    out = jax.block_until_ready(gaussian_loglike(distr_params, groundtruth, mask))
    ref = _reference(distr_params, groundtruth, mask)
    assert out.shape == (N,)
    assert jnp.allclose(out, ref, rtol=1e-5, atol=1e-3), (out, ref)

    # 2) mask=None specialization (2-input kernel)
    out_nm = jax.block_until_ready(gaussian_loglike(distr_params, groundtruth))
    ref_nm = _reference(distr_params, groundtruth)
    assert jnp.allclose(out_nm, ref_nm, rtol=1e-5, atol=1e-3), (out_nm, ref_nm)

    # 3) approx EUP-reciprocal variant (looser tolerance: ~12-bit reciprocal)
    out_ap = jax.block_until_ready(
        gaussian_loglike(distr_params, groundtruth, mask, approx_reciprocal=True))
    assert jnp.allclose(out_ap, ref, rtol=5e-2, atol=5.0), (out_ap, ref)

    # 4) large-sample row-blocked path (forced small row budget), ragged tail,
    #    with mask: rows = 10 -> block_rows = 8, last block ragged.
    C4, H4, W4 = 5, 16, 16                      # D = 1280 -> rows = 10
    dp4 = jax.random.normal(k1, (N, 2 * C4, H4, W4), dtype=jnp.float32)
    gt4 = jax.random.normal(k2, (N, C4, H4, W4), dtype=jnp.float32)
    mk4 = (jax.random.uniform(k3, (N, C4, H4, W4)) > 0.5).astype(jnp.float32)
    out4 = jax.block_until_ready(gaussian_loglike(dp4, gt4, mk4, _force_max_rows=8))
    ref4 = _reference(dp4, gt4, mk4)
    assert jnp.allclose(out4, ref4, rtol=1e-5, atol=1e-3), (out4, ref4)

    # 5) row-blocked path, clean divisor (no ragged tail), mask=None
    C5, H5, W5 = 4, 16, 32                      # D = 2048 -> rows = 16
    dp5 = jax.random.normal(k1, (N, 2 * C5, H5, W5), dtype=jnp.float32)
    gt5 = jax.random.normal(k2, (N, C5, H5, W5), dtype=jnp.float32)
    out5 = jax.block_until_ready(gaussian_loglike(dp5, gt5, _force_max_rows=8))
    ref5 = _reference(dp5, gt5)
    assert jnp.allclose(out5, ref5, rtol=1e-5, atol=1e-3), (out5, ref5)

    # 6) fallback path (D % 128 != 0), single lane tile, with mask
    C6, H6, W6 = 3, 5, 7                        # D = 105
    dp6 = jax.random.normal(k1, (N, 2 * C6, H6, W6), dtype=jnp.float32)
    gt6 = jax.random.normal(k2, (N, C6, H6, W6), dtype=jnp.float32)
    mk6 = (jax.random.uniform(k3, (N, C6, H6, W6)) > 0.3).astype(jnp.float32)
    out6 = jax.block_until_ready(gaussian_loglike(dp6, gt6, mk6))
    ref6 = _reference(dp6, gt6, mk6)
    assert jnp.allclose(out6, ref6, rtol=1e-5, atol=1e-3), (out6, ref6)

    # 7) fallback path with ragged lane tile (forced), mask=None
    C7, H7, W7 = 3, 10, 10                      # D = 300, tile = 256, tail = 44
    dp7 = jax.random.normal(k1, (N, 2 * C7, H7, W7), dtype=jnp.float32)
    gt7 = jax.random.normal(k2, (N, C7, H7, W7), dtype=jnp.float32)
    out7 = jax.block_until_ready(gaussian_loglike(dp7, gt7, _force_flat_tile=256))
    ref7 = _reference(dp7, gt7)
    assert jnp.allclose(out7, ref7, rtol=1e-5, atol=1e-3), (out7, ref7)

    print("KERNEL_OK")
</pallas_src>

<mosaic_0001>
module attributes {stable_mosaic.version = 11 : i64} {
  func.func @_batch_kernel(%arg0: i32, %arg1: memref<2x2x8x128xf32, #tpu.memory_space<vmem>>, %arg2: memref<2x8x128xf32, #tpu.memory_space<vmem>>, %arg3: memref<2x8x128xf32, #tpu.memory_space<vmem>>, %arg4: memref<2x1x1xf32, #tpu.memory_space<vmem>>) attributes {dimension_semantics = [#tpu.dimension_semantics<parallel>], iteration_bounds = array<i64: 1>, scalar_prefetch = 0 : i64, scratch_operands = 0 : i64, tpu.core_type = #tpu.core_type<tc>, window_params = [{transform_indices = @transform_0, window_bounds = array<i64: 2, 2, 8, 128>}, {transform_indices = @transform_1, window_bounds = array<i64: 2, 8, 128>}, {transform_indices = @transform_2, window_bounds = array<i64: 2, 8, 128>}, {transform_indices = @transform_3, window_bounds = array<i64: 2, 1, 1>}]} {
    %c0 = arith.constant 0 : index
    %c0_0 = arith.constant 0 : index
    %c0_1 = arith.constant 0 : index
    %c0_2 = arith.constant 0 : index
    %0 = vector.load %arg1[%c0, %c0_0, %c0_1, %c0_2] : memref<2x2x8x128xf32, #tpu.memory_space<vmem>>, vector<2x1x8x128xf32>
    %1 = vector.shape_cast %0 : vector<2x1x8x128xf32> to vector<2x8x128xf32>
    %c0_3 = arith.constant 0 : index
    %c1 = arith.constant 1 : index
    %c0_4 = arith.constant 0 : index
    %c0_5 = arith.constant 0 : index
    %2 = vector.load %arg1[%c0_3, %c1, %c0_4, %c0_5] : memref<2x2x8x128xf32, #tpu.memory_space<vmem>>, vector<2x1x8x128xf32>
    %3 = vector.shape_cast %2 : vector<2x1x8x128xf32> to vector<2x8x128xf32>
    %c0_6 = arith.constant 0 : index
    %c0_7 = arith.constant 0 : index
    %c0_8 = arith.constant 0 : index
    %4 = vector.load %arg2[%c0_6, %c0_7, %c0_8] : memref<2x8x128xf32, #tpu.memory_space<vmem>>, vector<2x8x128xf32>
    %cst = arith.constant 0.000000e+00 : f32
    %5 = vector.broadcast %cst : f32 to vector<2x8x128xf32>
    %6 = arith.maximumf %3, %5 : vector<2x8x128xf32>
    %7 = math.absf %3 : vector<2x8x128xf32>
    %cst_9 = arith.constant 0.000000e+00 : f32
    %8 = vector.broadcast %cst_9 : f32 to vector<2x8x128xf32>
    %9 = arith.subf %8, %7 : vector<2x8x128xf32>
    %10 = math.exp %9 : vector<2x8x128xf32>
    %11 = math.log1p %10 : vector<2x8x128xf32>
    %12 = arith.addf %6, %11 : vector<2x8x128xf32>
    %cst_10 = arith.constant 0.00999999977 : f32
    %13 = vector.broadcast %cst_10 : f32 to vector<2x8x128xf32>
    %14 = arith.maximumf %12, %13 : vector<2x8x128xf32>
    %15 = arith.subf %4, %1 : vector<2x8x128xf32>
    %16 = arith.divf %15, %14 : vector<2x8x128xf32>
    %cst_11 = arith.constant -5.000000e-01 : f32
    %17 = vector.broadcast %cst_11 : f32 to vector<2x8x128xf32>
    %18 = arith.mulf %17, %16 : vector<2x8x128xf32>
    %19 = arith.mulf %18, %16 : vector<2x8x128xf32>
    %20 = math.log %14 : vector<2x8x128xf32>
    %21 = arith.subf %19, %20 : vector<2x8x128xf32>
    %cst_12 = arith.constant 0.918938517 : f32
    %22 = vector.broadcast %cst_12 : f32 to vector<2x8x128xf32>
    %23 = arith.subf %21, %22 : vector<2x8x128xf32>
    %c0_13 = arith.constant 0 : index
    %c0_14 = arith.constant 0 : index
    %c0_15 = arith.constant 0 : index
    %24 = vector.load %arg3[%c0_13, %c0_14, %c0_15] : memref<2x8x128xf32, #tpu.memory_space<vmem>>, vector<2x8x128xf32>
    %25 = arith.mulf %23, %24 : vector<2x8x128xf32>
    %cst_16 = arith.constant dense<0.000000e+00> : vector<2x128xf32>
    %26 = vector.multi_reduction <add>, %25, %cst_16 [1] : vector<2x8x128xf32> to vector<2x128xf32>
    %27 = vector.shape_cast %26 : vector<2x128xf32> to vector<2x1x128xf32>
    %cst_17 = arith.constant dense<0.000000e+00> : vector<2x1xf32>
    %28 = vector.multi_reduction <add>, %27, %cst_17 [2] : vector<2x1x128xf32> to vector<2x1xf32>
    %29 = vector.shape_cast %28 : vector<2x1xf32> to vector<2x1x1xf32>
    %c0_18 = arith.constant 0 : index
    %c0_19 = arith.constant 0 : index
    %c0_20 = arith.constant 0 : index
    %30 = vector.load %arg4[%c0_18, %c0_19, %c0_20] : memref<2x1x1xf32, #tpu.memory_space<vmem>>, vector<2x1x1xf32>
    tpu.vector_store %arg4[%c0_18, %c0_19, %c0_20], %29 {strides = array<i32>} : memref<2x1x1xf32, #tpu.memory_space<vmem>>, vector<2x1x1xf32>,
    return
  }
  func.func @transform_0(%arg0: i32) -> (i32, i32, i32, i32) {
    %c0_i32 = arith.constant 0 : i32
    %c0_i32_0 = arith.constant 0 : i32
    %c0_i32_1 = arith.constant 0 : i32
    %c0_i32_2 = arith.constant 0 : i32
    return %arg0, %c0_i32, %c0_i32_0, %c0_i32_1 : i32, i32, i32, i32
  }
  func.func @transform_1(%arg0: i32) -> (i32, i32, i32) {
    %c0_i32 = arith.constant 0 : i32
    %c0_i32_0 = arith.constant 0 : i32
    %c0_i32_1 = arith.constant 0 : i32
    return %arg0, %c0_i32, %c0_i32_0 : i32, i32, i32
  }
  func.func @transform_2(%arg0: i32) -> (i32, i32, i32) {
    %c0_i32 = arith.constant 0 : i32
    %c0_i32_0 = arith.constant 0 : i32
    %c0_i32_1 = arith.constant 0 : i32
    return %arg0, %c0_i32, %c0_i32_0 : i32, i32, i32
  }
  func.func @transform_3(%arg0: i32) -> (i32, i32, i32) {
    %c0_i32 = arith.constant 0 : i32
    %c0_i32_0 = arith.constant 0 : i32
    %c0_i32_1 = arith.constant 0 : i32
    return %arg0, %c0_i32, %c0_i32_0 : i32, i32, i32
  }
}

</mosaic_0001>

<bundles_post_ra>
// kernel: tpu_custom_call.1
= control target key start
LH: loop header
LB: loop body
LE: loop exit
PB: predicated region body
PF: predicated region fallthrough
CT: control target
= control target key end

     0   :  { %8 = vsyncpa [#allocation3], 0  ;;  %s317_s0 = inlined_call_operand.hbm [shape: f32[2,2,8,128], index: 0, kind: input, shape index: {}]   ;;  %s318_s1 = inlined_call_operand.hbm [shape: f32[2,8,128], index: 1, kind: input, shape index: {}]   ;;  %s319_s2 = inlined_call_operand.hbm [shape: f32[2,8,128], index: 2, kind: input, shape index: {}]   ;;  %s320_s3 = inlined_call_operand.vmem [shape: f32[2,1,1], index: 3, kind: output, shape index: {}]  }
   0x1   :  { %9 = vsyncpa [#allocation5], 0  ;;  %s234_s12 = smov [#allocation4]   ;;  %s235_s14 = smov [#allocation2]  }
   0x2   :  { %s27_s13 = sshll.u32 %s234_s12, 4  ;;  %s15_s15 = sshll.u32 %s235_s14, 4  ;;  %s28_s13 = int_to_ptr.vmem [resolvable:$true] %s27_s13  ;;  %s259_s15 = int_to_ptr.vmem [resolvable:$true] %s15_s15 }
   0x3   :  { %s164_s18 = scalar_lea.hbm %s318_s1, 256 }
   0x4   :  { %p165_p0 = scmp.ne.s32.totalorder %s318_s1, %s164_s18  ;;  %p168_p1 = scmp.lt.u32.totalorder %s164_s18, %s318_s1 }
   0x6   :  { %p170_p2 = pnand %p168_p1, %p165_p0 }
   0x8   :  { %173 = shalt.err (!%p170_p2)
}
   0x9   :  { %s174_s23 = scalar_lea.vmem %s28_s13, 256  ;;  %p179_p4 = scmp.lt.s32.totalorder %s28_s13, %s28_s13 }
   0xa   :  { %p175_p3 = scmp.ne.s32.totalorder %s28_s13, %s174_s23  ;;  %p180_p5 = scmp.lt.s32.totalorder %s174_s23, %s174_s23 }
   0xc   :  { %p181_p6 = por %p180_p5, %p179_p4 }
   0xe   :  { %p182_p7 = pnand %p181_p6, %p175_p3 }
  0x10   :  { %185 = shalt.err (!%p182_p7)
}
  0x11   :  { %s236_s24 = smov 128   ;;  %s237_s25 = smov 8  }
  0x12   :  { %33 = dma.hbm_to_vmem [thread:$0]  %s318_s1, 256, %s28_s13, [#allocation5], %s236_s24, %s236_s24, %s237_s25  }
  0x13   :  { %s186_s30 = scalar_lea.hbm %s317_s0, 512 }
  0x14   :  { %p187_p8 = scmp.ne.s32.totalorder %s317_s0, %s186_s30  ;;  %p190_p9 = scmp.lt.u32.totalorder %s186_s30, %s317_s0 }
  0x16   :  { %p192_p10 = pnand %p190_p9, %p187_p8 }
  0x18   :  { %195 = shalt.err (!%p192_p10)
}
  0x19   :  { %s196_s8 = scalar_lea.vmem %s259_s15, 512  ;;  %p201_p12 = scmp.lt.s32.totalorder %s259_s15, %s259_s15 }
  0x1a   :  { %p197_p11 = scmp.ne.s32.totalorder %s259_s15, %s196_s8  ;;  %p202_p13 = scmp.lt.s32.totalorder %s196_s8, %s196_s8 }
  0x1c   :  { %p203_p0 = por %p202_p13, %p201_p12 }
  0x1e   :  { %p204_p1 = pnand %p203_p0, %p197_p11 }
  0x20   :  { %207 = shalt.err (!%p204_p1)
}
  0x21   :  { %21 = dma.hbm_to_vmem [thread:$0]  %s317_s0, 512, %s259_s15, [#allocation3], %s236_s24, %s236_s24, %s237_s25  }
  0x22   :  { %s238_s10 = smov [#allocation6]   ;;  %s208_s14 = scalar_lea.hbm %s319_s2, 256 }
  0x23   :  { %s39_s11 = sshll.u32 %s238_s10, 4  ;;  %p209_p2 = scmp.ne.s32.totalorder %s319_s2, %s208_s14  ;;  %s40_s11 = int_to_ptr.vmem [resolvable:$true] %s39_s11 }
  0x24   :  { %p212_p3 = scmp.lt.u32.totalorder %s208_s14, %s319_s2 }
  0x26   :  { %p214_p4 = pnand %p212_p3, %p209_p2 }
  0x28   :  { %217 = shalt.err (!%p214_p4)
}
  0x29   :  { %s218_s20 = scalar_lea.vmem %s40_s11, 256  ;;  %p223_p6 = scmp.lt.s32.totalorder %s40_s11, %s40_s11 }
  0x2a   :  { %p219_p5 = scmp.ne.s32.totalorder %s40_s11, %s218_s20  ;;  %p224_p7 = scmp.lt.s32.totalorder %s218_s20, %s218_s20 }
  0x2c   :  { %p225_p8 = por %p224_p7, %p223_p6 }
  0x2e   :  { %p226_p9 = pnand %p225_p8, %p219_p5 }
  0x30   :  { %229 = shalt.err (!%p226_p9)
}
  0x31   :  { %45 = dma.hbm_to_vmem [thread:$0]  %s319_s2, 256, %s40_s11, [#allocation5], %s236_s24, %s236_s24, %s237_s25  }
  0x32   :  { %230 = dma.done.wait [#allocation3], 512  }
  0x33   :  { %231 = vsyncadd [#allocation3], 4294966784 }
  0x34   :  { %232 = dma.done.wait [#allocation5], 512  }
  0x35   :  { %233 = vsyncadd [#allocation5], 4294966784  ;;  %v58_v0 = vld [vmem:[#allocation2 + $0x8] sm:$0xff]  ;;  %v59_v2 = vld [vmem:[#allocation2 + $0x18] sm:$0xff]  ;;  %vm132_vm2 = vcmask 0  }
  0x36   :  { %v64_v1 = vand.u32 2147483647, %v58_v0  ;;  %v65_v3 = vand.u32 2147483647, %v59_v2  ;;  %v62_v20 = vmax.f32 %v58_v0, 0.0  ;;  %v63_v24 = vmax.f32 %v59_v2, 0.0 }
  0x37   :  { %v55_v32 = vld [vmem:[#allocation2] sm:$0xff]  ;;  %v56_v34 = vld [vmem:[#allocation2 + $0x10] sm:$0xff]  ;;  %v61_v35 = vld [vmem:[#allocation4 + $0x8] sm:$0xff] }
  0x38   :  { %v66_v4 = vsub.f32 0.0, %v64_v1  ;;  %v67_v5 = vsub.f32 0.0, %v65_v3  ;;  %v60_v33 = vld [vmem:[#allocation4] sm:$0xff]  ;;  %v95_v37 = vsub.f32 %v61_v35, %v56_v34  ;;  %v112_v51 = vld [vmem:[#allocation6] sm:$0xff]  ;;  %v113_v54 = vld [vmem:[#allocation6 + $0x8] sm:$0xff] }
  0x39   :  { %v94_v36 = vsub.f32 %v60_v33, %v55_v32 }
  0x3a   :  { %v68_v6 = vmul.f32 1.442695, %v66_v4  ;;  %v70_v7 = vmul.f32 1.442695, %v67_v5 }
  0x3c   :  { %148 = vpow2.f32 %v68_v6 }
  0x3d   :  { %150 = vpow2.f32 %v70_v7 }
  0x46   :  { %v149_v8 = vpop.eup %148 }
  0x47   :  { %v151_v9 = vpop.eup %150  ;;  %v72_v10 = vadd.f32 1.0, %v149_v8  ;;  %v75_v12 = vmul.f32 -0.5, %v149_v8  ;;  %v78_v15 = vand.u32 2147483647, %v149_v8 }
  0x48   :  { %v81_v11 = vadd.f32 1.0, %v151_v9  ;;  %v84_v13 = vmul.f32 -0.5, %v151_v9  ;;  %v87_v17 = vand.u32 2147483647, %v151_v9 }
  0x49   :  { %152 = vlog2.f32 %v72_v10  ;;  %v76_v14 = vadd.f32 1.0, %v75_v12  ;;  %vm79_vm0 = vcmp.lt.f32.partialorder %v78_v15, 0.0004427343 }
  0x4a   :  { %154 = vlog2.f32 %v81_v11  ;;  %v85_v16 = vadd.f32 1.0, %v84_v13  ;;  %vm88_vm1 = vcmp.lt.f32.partialorder %v87_v17, 0.0004427343 }
  0x4b   :  { %v77_v18 = vmul.f32 %v149_v8, %v76_v14 }
  0x4c   :  { %v86_v21 = vmul.f32 %v151_v9, %v85_v16 }
  0x53   :  { %v153_v19 = vpop.eup %152 }
  0x54   :  { %v155_v22 = vpop.eup %154  ;;  %v74_v23 = vmul.f32 0.6931472, %v153_v19 }
  0x55   :  { %v83_v25 = vmul.f32 0.6931472, %v155_v22 }
  0x56   :  { %v80_v26 = vsel %vm79_vm0, %v77_v18, %v74_v23 }
  0x57   :  { %v90_v27 = vadd.f32 %v80_v26, %v62_v20  ;;  %v89_v28 = vsel %vm88_vm1, %v86_v21, %v83_v25 }
  0x58   :  { %v91_v29 = vadd.f32 %v89_v28, %v63_v24 }
  0x59   :  { %v92_v30 = vmax.f32 %v90_v27, 0.01 }
  0x5a   :  { %v93_v31 = vmax.f32 %v91_v29, 0.01 }
  0x5b   :  { %156 = vrcp.f32 %v92_v30 }
  0x5c   :  { %158 = vlog2.f32 %v92_v30 }
  0x5d   :  { %160 = vrcp.f32 %v93_v31 }
  0x5e   :  { %162 = vlog2.f32 %v93_v31 }
  0x65   :  { %v157_v38 = vpop.eup %156 }
  0x66   :  { %v159_v39 = vpop.eup %158  ;;  %v97_v40 = vmul.f32 %v157_v38, %v94_v36 }
  0x67   :  { %v161_v41 = vpop.eup %160  ;;  %v105_v44 = vmul.f32 0.6931472, %v159_v39 }
  0x68   :  { %v163_v42 = vpop.eup %162  ;;  %v100_v43 = vmul.f32 -0.5, %v97_v40  ;;  %v99_v45 = vmul.f32 %v161_v41, %v95_v37 }
  0x69   :  { %v107_v48 = vmul.f32 0.6931472, %v163_v42 }
  0x6a   :  { %v102_v46 = vmul.f32 %v100_v43, %v97_v40  ;;  %v101_v47 = vmul.f32 -0.5, %v99_v45 }
  0x6c   :  { %v108_v49 = vsub.f32 %v102_v46, %v105_v44  ;;  %v103_v50 = vmul.f32 %v101_v47, %v99_v45 }
  0x6e   :  { %v141_v52 = vadd.f32 -0.9189385, %v108_v49  ;;  %v109_v53 = vsub.f32 %v103_v50, %v107_v48 }
  0x70   :  { %v114_v55 = vmul.f32 %v141_v52, %v112_v51  ;;  %v142_v56 = vadd.f32 -0.9189385, %v109_v53 }
  0x72   :  { %v116_v57 = vrot.slane %v114_v55, 4  ;;  %v115_v58 = vmul.f32 %v142_v56, %v113_v54 }
  0x74   :  { %v117_v59 = vadd.f32 %v116_v57, %v114_v55  ;;  %v122_v60 = vrot.slane %v115_v58, 4 }
  0x76   :  { %v118_v61 = vrot.slane %v117_v59, 2  ;;  %v123_v62 = vadd.f32 %v122_v60, %v115_v58 }
  0x78   :  { %v119_v63 = vadd.f32 %v118_v61, %v117_v59  ;;  %v124_v0 = vrot.slane %v123_v62, 2 }
  0x7a   :  { %v120_v1 = vrot.slane %v119_v63, 1  ;;  %v125_v2 = vadd.f32 %v124_v0, %v123_v62 }
  0x7c   :  { %v121_v3 = vadd.f32 %v120_v1, %v119_v63  ;;  %v126_v4 = vrot.slane %v125_v2, 1 }
  0x7e   :  { %128 = vadd.xlane.f32.xlu0 %v121_v3  ;;  %v127_v5 = vadd.f32 %v126_v4, %v125_v2 }
  0x82   :  { %130 = vadd.xlane.f32.xlu0 %v127_v5 }
 0x10b   :  { %v129_v6 = vpop.xlane.xlu0 %128 }
 0x10c   :  { %133 = vst.msk [vmem:[%s320_s3] sm:$0x1] %vm132_vm2, %v129_v6 }
 0x10f   :  { %v131_v7 = vpop.xlane.xlu0 %130 }
 0x110   :  { %134 = vst.msk [vmem:[%s320_s3 + $0x1] sm:$0x1] %vm132_vm2, %v131_v7 }
 0x111   :  { %139 = vsyncpa [#allocation3], 1 }
 0x112   :  { %140 = vsyncpa [#allocation5], 1 }

</bundles_post_ra>
